<compile_context>
chip_gen: v7x
topology: tpu7x:2x2x1
jax: 0.10.0
libtpu: 0.0.40
codegen_flags: <defaults>
</compile_context>

<pallas_src>
import math
import functools

import jax
import jax.numpy as jnp
from jax.experimental import pallas as pl
from jax.experimental.pallas import tpu as pltpu


def _mha_kernel(x_ref, mask_ref, wq_ref, wk_ref, wv_ref, wo_ref, vecs_ref,
                o_ref, k_scratch, v_scratch,
                *, n_heads, dim_per_head, q_tile, apply_mask, use_ln, ln_eps,
                approx_recip):
    qi = pl.program_id(1)                      # query-tile index
    slen = x_ref.shape[1]
    dim = n_heads * dim_per_head
    cdtype = x_ref.dtype                       # MXU input dtype (bf16 or f32)

    vecs = vecs_ref[...]                       # (6, dim) f32: bq,bk,bv,bo,gamma,beta
    bq = vecs[0:1, :]
    bk = vecs[1:2, :]
    bv = vecs[2:3, :]
    bo = vecs[3:4, :]

    # --- K/V projections: computed once per batch element (qi == 0), kept resident
    #     in VMEM scratch in (n_heads, klen, dh) layout across all q tiles. ---
    @pl.when(qi == 0)
    def _():
        x_full = x_ref[0]                      # (slen, dim)
        k = jnp.dot(x_full, wk_ref[...], preferred_element_type=jnp.float32) + bk
        v = jnp.dot(x_full, wv_ref[...], preferred_element_type=jnp.float32) + bv
        k_scratch[...] = (k.reshape(slen, n_heads, dim_per_head)
                           .transpose(1, 0, 2).astype(cdtype))
        v_scratch[...] = (v.reshape(slen, n_heads, dim_per_head)
                           .transpose(1, 0, 2).astype(cdtype))

    # --- Q projection for this query tile (1/sqrt(dh) already folded into Wq/bq) ---
    q_start = pl.multiple_of(qi * q_tile, q_tile)
    xq = x_ref[0, pl.ds(q_start, q_tile), :]   # (tq, dim)
    q = jnp.dot(xq, wq_ref[...], preferred_element_type=jnp.float32) + bq
    q3 = (q.reshape(q_tile, n_heads, dim_per_head)
           .transpose(1, 0, 2).astype(cdtype))                  # (h, tq, dh)

    # --- attention, batched over heads (single MXU einsum per stage) ---
    s = jnp.einsum("hqd,hkd->hqk", q3, k_scratch[...],
                   preferred_element_type=jnp.float32)          # (h, tq, klen)

    if apply_mask:
        # masked_fill_(mask == 0, 1e-10) of the PyTorch module (note: 1e-10, not -inf).
        m = mask_ref[0]                                          # (1, klen)
        s = jnp.where(m[None, :, :] == 0.0, 1e-10, s)

    s = s - jnp.max(s, axis=-1, keepdims=True)
    e = jnp.exp(s)
    w = e * pl.reciprocal(jnp.sum(e, axis=-1, keepdims=True), approx=approx_recip)

    ctx = jnp.einsum("hqk,hkd->hqd", w.astype(cdtype), v_scratch[...],
                     preferred_element_type=jnp.float32)        # (h, tq, dh)
    ctx = ctx.transpose(1, 0, 2).reshape(q_tile, dim)           # (tq, dim)

    out = jnp.dot(ctx.astype(cdtype), wo_ref[...],
                  preferred_element_type=jnp.float32) + bo      # (tq, dim)

    if use_ln:
        gamma = vecs[4:5, :]
        beta = vecs[5:6, :]
        mean = jnp.mean(out, axis=-1, keepdims=True)
        var = jnp.mean((out - mean) ** 2, axis=-1, keepdims=True)
        out = (out - mean) * jax.lax.rsqrt(var + ln_eps) * gamma + beta

    o_ref[0] = out.astype(o_ref.dtype)


def _pick_q_tile(slen):
    for t in (512, 256, 128):
        if slen % t == 0:
            return t
    return slen


def xlm_mha_forward(hidden_states, params, *, n_heads, mask=None, ln_params=None,
                    ln_eps=1e-12, compute_dtype=jnp.bfloat16, approx_recip=True,
                    q_tile=None):
    """hidden_states: (bs, slen, dim) f32. params: dict of f32 Linear weights/biases.

    mask:        optional (bs, slen) array; None means all-ones (test config) and the
                 masked_fill becomes dead code that is elided at trace time.
    ln_params:   optional {"gamma","beta"} for the fused LayerNorm the pybuda test
                 applies after the attention module; None = plain module output.
    compute_dtype: dtype fed to the MXU (bf16 default; f32 for bit-accurate checks).
    """
    bs, slen, dim = hidden_states.shape
    assert dim % n_heads == 0
    dh = dim // n_heads
    scale = 1.0 / math.sqrt(dh)

    if q_tile is None:
        q_tile = _pick_q_tile(slen)
    assert slen % q_tile == 0
    n_q_tiles = slen // q_tile

    # PyTorch nn.Linear stores weight as (out, in); pre-transpose to (in, out) so the
    # kernel computes x @ W. Fold the 1/sqrt(dh) query scale into Wq/bq. Pre-cast the
    # weights to the MXU compute dtype (halves weight VMEM/DMA bytes when bf16).
    wq = (params["wq"].T * scale).astype(compute_dtype)
    wk = params["wk"].T.astype(compute_dtype)
    wv = params["wv"].T.astype(compute_dtype)
    wo = params["wo"].T.astype(compute_dtype)

    use_ln = ln_params is not None
    gamma = ln_params["gamma"] if use_ln else jnp.ones((dim,), jnp.float32)
    beta = ln_params["beta"] if use_ln else jnp.zeros((dim,), jnp.float32)
    # Pack the six per-feature vectors into one (6, dim) f32 operand (single DMA stream).
    vecs = jnp.stack([params["bq"] * scale, params["bk"], params["bv"],
                      params["bo"], gamma, beta]).astype(jnp.float32)

    apply_mask = mask is not None
    if mask is None:
        mask_arr = jnp.ones((bs, 1, slen), jnp.float32)   # tiny, never read in-kernel
    else:
        mask_arr = mask.reshape(bs, 1, slen).astype(jnp.float32)

    x = hidden_states.astype(compute_dtype)

    kernel = functools.partial(_mha_kernel,
                               n_heads=n_heads, dim_per_head=dh, q_tile=q_tile,
                               apply_mask=apply_mask, use_ln=use_ln, ln_eps=ln_eps,
                               approx_recip=approx_recip)

    rep = lambda shape: pl.BlockSpec(shape, lambda b, qi: (0,) * len(shape))

    return pl.pallas_call(
        kernel,
        out_shape=jax.ShapeDtypeStruct((bs, slen, dim), jnp.float32),
        grid_spec=pltpu.PrefetchScalarGridSpec(
            num_scalar_prefetch=0,
            grid=(bs, n_q_tiles),
            in_specs=[
                # full sequence per batch element; block index ignores qi so it stays
                # resident (no re-DMA) across the q-tile axis
                pl.BlockSpec((1, slen, dim), lambda b, qi: (b, 0, 0)),
                pl.BlockSpec((1, 1, slen), lambda b, qi: (b, 0, 0)),   # mask row
                rep((dim, dim)), rep((dim, dim)),          # Wq, Wk
                rep((dim, dim)), rep((dim, dim)),          # Wv, Wo
                rep((6, dim)),                             # packed bq,bk,bv,bo,gamma,beta
            ],
            out_specs=pl.BlockSpec((1, q_tile, dim), lambda b, qi: (b, qi, 0)),
            scratch_shapes=[pltpu.VMEM((n_heads, slen, dh), compute_dtype),   # K
                            pltpu.VMEM((n_heads, slen, dh), compute_dtype)],  # V
        ),
        compiler_params=pltpu.CompilerParams(
            dimension_semantics=("parallel", "arbitrary"),
            vmem_limit_bytes=64 * 1024 * 1024,
        ),
    )(x, mask_arr, wq, wk, wv, wo, vecs)


def _reference_forward(x, params, *, n_heads, mask=None, ln_params=None, ln_eps=1e-12):
    """Pure-JAX reference mirroring the PyTorch forward (for verification)."""
    bs, slen, dim = x.shape
    dh = dim // n_heads

    def lin(a, w, b):
        return jnp.einsum("bsd,od->bso", a, w) + b

    def split_heads(a):
        return a.reshape(bs, slen, n_heads, dh).transpose(0, 2, 1, 3)

    q = split_heads(lin(x, params["wq"], params["bq"])) / math.sqrt(dh)
    k = split_heads(lin(x, params["wk"], params["bk"]))
    v = split_heads(lin(x, params["wv"], params["bv"]))

    scores = jnp.einsum("bhqd,bhkd->bhqk", q, k)
    if mask is None:
        mask = jnp.ones((bs, slen), jnp.float32)
    m = (mask == 0).reshape(bs, 1, 1, slen)
    scores = jnp.where(m, 1e-10, scores)
    weights = jax.nn.softmax(scores, axis=-1)
    ctx = jnp.einsum("bhqk,bhkd->bhqd", weights, v)
    ctx = ctx.transpose(0, 2, 1, 3).reshape(bs, slen, dim)
    out = lin(ctx, params["wo"], params["bo"])

    if ln_params is not None:
        mean = jnp.mean(out, axis=-1, keepdims=True)
        var = jnp.mean((out - mean) ** 2, axis=-1, keepdims=True)
        out = ((out - mean) * jax.lax.rsqrt(var + ln_eps)
               * ln_params["gamma"] + ln_params["beta"])
    return out


if __name__ == "__main__":
    def make_params(key, dim):
        keys = jax.random.split(key, 8)
        bound = 1.0 / math.sqrt(dim)   # PyTorch nn.Linear default init range
        p = {}
        for name, kk in zip(("wq", "wk", "wv", "wo"), keys[:4]):
            p[name] = jax.random.uniform(kk, (dim, dim), jnp.float32, -bound, bound)
        for name, kk in zip(("bq", "bk", "bv", "bo"), keys[4:]):
            p[name] = jax.random.uniform(kk, (dim,), jnp.float32, -bound, bound)
        return p

    key = jax.random.PRNGKey(0)

    # --- small config (matches the module: dim % n_heads == 0) ---
    bs, slen, dim, n_heads = 2, 8, 32, 4
    kp, kx, km, key = jax.random.split(key, 4)
    params = make_params(kp, dim)
    x = jax.random.normal(kx, (bs, slen, dim), jnp.float32)

    # precise path (f32 MXU inputs, exact reciprocal): tight check of the kernel logic
    ref = _reference_forward(x, params, n_heads=n_heads)
    out_f32 = jax.block_until_ready(
        xlm_attention_out := xlm_mha_forward(x, params, n_heads=n_heads,
                                             compute_dtype=jnp.float32,
                                             approx_recip=False))
    assert out_f32.shape == (bs, slen, dim)
    assert jnp.allclose(out_f32, ref, atol=1e-4, rtol=1e-4), "f32 mismatch vs. reference"

    # explicit mask path (masked_fill(mask==0, 1e-10) semantics)
    mask = (jax.random.uniform(km, (bs, slen)) > 0.3).astype(jnp.float32)
    ref_m = _reference_forward(x, params, n_heads=n_heads, mask=mask)
    out_m = jax.block_until_ready(
        xlm_mha_forward(x, params, n_heads=n_heads, mask=mask,
                        compute_dtype=jnp.float32, approx_recip=False))
    assert jnp.allclose(out_m, ref_m, atol=1e-4, rtol=1e-4), "masked f32 mismatch"

    # default fast path (bf16 MXU inputs + f32 accumulation + approx reciprocal)
    out_bf = jax.block_until_ready(xlm_mha_forward(x, params, n_heads=n_heads))
    rel = jnp.linalg.norm(out_bf - ref) / jnp.linalg.norm(ref)
    assert float(rel) < 2e-2, f"bf16 relative error too large: {float(rel)}"

    # --- larger config exercising the q-tile grid axis (grid = (bs, 2)) ---
    bs2, slen2, dim2, n_heads2 = 2, 256, 128, 4
    kp2, kx2, key = jax.random.split(key, 3)
    params2 = make_params(kp2, dim2)
    x2 = jax.random.normal(kx2, (bs2, slen2, dim2), jnp.float32)
    ln2 = {"gamma": jnp.ones((dim2,), jnp.float32) * 1.1,
           "beta": jnp.full((dim2,), 0.05, jnp.float32)}

    ref2 = _reference_forward(x2, params2, n_heads=n_heads2)
    out2_f32 = jax.block_until_ready(
        xlm_mha_forward(x2, params2, n_heads=n_heads2,
                        compute_dtype=jnp.float32, approx_recip=False, q_tile=128))
    assert jnp.allclose(out2_f32, ref2, atol=1e-4, rtol=1e-4), "tiled f32 mismatch"

    out2_bf = jax.block_until_ready(
        xlm_mha_forward(x2, params2, n_heads=n_heads2, q_tile=128))
    rel2 = jnp.linalg.norm(out2_bf - ref2) / jnp.linalg.norm(ref2)
    assert float(rel2) < 2e-2, f"tiled bf16 relative error too large: {float(rel2)}"

    # fused-LayerNorm variant (how the pybuda test wraps the module)
    ref2_ln = _reference_forward(x2, params2, n_heads=n_heads2, ln_params=ln2)
    out2_ln = jax.block_until_ready(
        xlm_mha_forward(x2, params2, n_heads=n_heads2, ln_params=ln2,
                        compute_dtype=jnp.float32, approx_recip=False, q_tile=128))
    assert jnp.allclose(out2_ln, ref2_ln, atol=1e-4, rtol=1e-4), "LN variant mismatch"

    # TODO(synk): kv/cache cross-attention & incremental decode cache, head_mask,
    # attention dropout and output_attentions are not implemented (kv=None, cache=None,
    # head_mask=None, p=0.0, output_attentions=False in the test config).
    print("KERNEL_OK")
</pallas_src>

<mosaic_0001>
module attributes {stable_mosaic.version = 11 : i64} {
  func.func @_mha_kernel(%arg0: i32, %arg1: i32, %arg2: memref<1x8x32xf32, #tpu.memory_space<vmem>>, %arg3: memref<1x1x8xf32, #tpu.memory_space<vmem>>, %arg4: memref<32x32xf32, #tpu.memory_space<vmem>>, %arg5: memref<32x32xf32, #tpu.memory_space<vmem>>, %arg6: memref<32x32xf32, #tpu.memory_space<vmem>>, %arg7: memref<32x32xf32, #tpu.memory_space<vmem>>, %arg8: memref<6x32xf32, #tpu.memory_space<vmem>>, %arg9: memref<1x8x32xf32, #tpu.memory_space<vmem>>, %arg10: memref<4x8x8xf32, #tpu.memory_space<vmem>>, %arg11: memref<4x8x8xf32, #tpu.memory_space<vmem>>) attributes {dimension_semantics = [#tpu.dimension_semantics<parallel>, #tpu.dimension_semantics<arbitrary>], iteration_bounds = array<i64: 2, 1>, scalar_prefetch = 0 : i64, scratch_operands = 2 : i64, tpu.core_type = #tpu.core_type<tc>, window_params = [{transform_indices = @transform_0, window_bounds = array<i64: 1, 8, 32>}, {transform_indices = @transform_1, window_bounds = array<i64: 1, 1, 8>}, {pipeline_mode = #tpu.pipeline_mode<synchronous>, transform_indices = @transform_2, window_bounds = array<i64: 32, 32>}, {pipeline_mode = #tpu.pipeline_mode<synchronous>, transform_indices = @transform_3, window_bounds = array<i64: 32, 32>}, {pipeline_mode = #tpu.pipeline_mode<synchronous>, transform_indices = @transform_4, window_bounds = array<i64: 32, 32>}, {pipeline_mode = #tpu.pipeline_mode<synchronous>, transform_indices = @transform_5, window_bounds = array<i64: 32, 32>}, {pipeline_mode = #tpu.pipeline_mode<synchronous>, transform_indices = @transform_6, window_bounds = array<i64: 6, 32>}, {transform_indices = @transform_7, window_bounds = array<i64: 1, 8, 32>}]} {
    %c0 = arith.constant 0 : index
    %c0_0 = arith.constant 0 : index
    %0 = vector.load %arg8[%c0, %c0_0] : memref<6x32xf32, #tpu.memory_space<vmem>>, vector<6x32xf32>
    %1 = vector.extract_strided_slice %0 {offsets = [0, 0], sizes = [1, 32], strides = [1, 1]} : vector<6x32xf32> to vector<1x32xf32>
    %2 = vector.extract_strided_slice %0 {offsets = [1, 0], sizes = [1, 32], strides = [1, 1]} : vector<6x32xf32> to vector<1x32xf32>
    %3 = vector.extract_strided_slice %0 {offsets = [2, 0], sizes = [1, 32], strides = [1, 1]} : vector<6x32xf32> to vector<1x32xf32>
    %4 = vector.extract_strided_slice %0 {offsets = [3, 0], sizes = [1, 32], strides = [1, 1]} : vector<6x32xf32> to vector<1x32xf32>
    %c0_i32 = arith.constant 0 : i32
    %5 = arith.cmpi eq, %arg1, %c0_i32 : i32
    %6 = arith.extui %5 : i1 to i32
    %c0_i32_1 = arith.constant 0 : i32
    %7 = arith.cmpi ne, %6, %c0_i32_1 : i32
    scf.if %7 {
      %c0_22 = arith.constant 0 : index
      %c0_23 = arith.constant 0 : index
      %c0_24 = arith.constant 0 : index
      %42 = vector.load %arg2[%c0_22, %c0_23, %c0_24] : memref<1x8x32xf32, #tpu.memory_space<vmem>>, vector<1x8x32xf32>
      %43 = vector.shape_cast %42 : vector<1x8x32xf32> to vector<8x32xf32>
      %c0_25 = arith.constant 0 : index
      %c0_26 = arith.constant 0 : index
      %44 = vector.load %arg5[%c0_25, %c0_26] : memref<32x32xf32, #tpu.memory_space<vmem>>, vector<32x32xf32>
      %cst_27 = arith.constant dense<0.000000e+00> : vector<8x32xf32>
      %45 = tpu.matmul %43, %44, %cst_27 {dimension_numbers = #tpu.dot_dimension_numbers<[1], [0], [0], [1], [0, 0, 1, 1], [], []>} : vector<8x32xf32>, vector<32x32xf32>, vector<8x32xf32> -> vector<8x32xf32>
      %46 = vector.broadcast %2 : vector<1x32xf32> to vector<8x32xf32>
      %47 = arith.addf %45, %46 : vector<8x32xf32>
      %c0_28 = arith.constant 0 : index
      %c0_29 = arith.constant 0 : index
      %48 = vector.load %arg6[%c0_28, %c0_29] : memref<32x32xf32, #tpu.memory_space<vmem>>, vector<32x32xf32>
      %cst_30 = arith.constant dense<0.000000e+00> : vector<8x32xf32>
      %49 = tpu.matmul %43, %48, %cst_30 {dimension_numbers = #tpu.dot_dimension_numbers<[1], [0], [0], [1], [0, 0, 1, 1], [], []>} : vector<8x32xf32>, vector<32x32xf32>, vector<8x32xf32> -> vector<8x32xf32>
      %50 = vector.broadcast %3 : vector<1x32xf32> to vector<8x32xf32>
      %51 = arith.addf %49, %50 : vector<8x32xf32>
      %52 = vector.shape_cast %47 : vector<8x32xf32> to vector<8x4x8xf32>
      %53 = tpu.transpose %52, [1, 0, 2] : vector<8x4x8xf32> -> vector<4x8x8xf32>
      %c0_31 = arith.constant 0 : index
      %c0_32 = arith.constant 0 : index
      %c0_33 = arith.constant 0 : index
      %54 = vector.load %arg10[%c0_31, %c0_32, %c0_33] : memref<4x8x8xf32, #tpu.memory_space<vmem>>, vector<4x8x8xf32>
      tpu.vector_store %arg10[%c0_31, %c0_32, %c0_33], %53 {strides = array<i32>} : memref<4x8x8xf32, #tpu.memory_space<vmem>>, vector<4x8x8xf32>,
      %55 = vector.shape_cast %51 : vector<8x32xf32> to vector<8x4x8xf32>
      %56 = tpu.transpose %55, [1, 0, 2] : vector<8x4x8xf32> -> vector<4x8x8xf32>
      %c0_34 = arith.constant 0 : index
      %c0_35 = arith.constant 0 : index
      %c0_36 = arith.constant 0 : index
      %57 = vector.load %arg11[%c0_34, %c0_35, %c0_36] : memref<4x8x8xf32, #tpu.memory_space<vmem>>, vector<4x8x8xf32>
      tpu.vector_store %arg11[%c0_34, %c0_35, %c0_36], %56 {strides = array<i32>} : memref<4x8x8xf32, #tpu.memory_space<vmem>>, vector<4x8x8xf32>,
    } else {
    }
    %c8_i32 = arith.constant 8 : i32
    %8 = arith.muli %arg1, %c8_i32 : i32
    %9 = tpu.assume_multiple %8, 8 : i32
    %c0_2 = arith.constant 0 : index
    %10 = arith.index_cast %9 : i32 to index
    %c0_3 = arith.constant 0 : index
    %11 = vector.load %arg2[%c0_2, %10, %c0_3] : memref<1x8x32xf32, #tpu.memory_space<vmem>>, vector<1x8x32xf32>
    %12 = vector.shape_cast %11 : vector<1x8x32xf32> to vector<8x32xf32>
    %c0_4 = arith.constant 0 : index
    %c0_5 = arith.constant 0 : index
    %13 = vector.load %arg4[%c0_4, %c0_5] : memref<32x32xf32, #tpu.memory_space<vmem>>, vector<32x32xf32>
    %cst = arith.constant dense<0.000000e+00> : vector<8x32xf32>
    %14 = tpu.matmul %12, %13, %cst {dimension_numbers = #tpu.dot_dimension_numbers<[1], [0], [0], [1], [0, 0, 1, 1], [], []>} : vector<8x32xf32>, vector<32x32xf32>, vector<8x32xf32> -> vector<8x32xf32>
    %15 = vector.broadcast %1 : vector<1x32xf32> to vector<8x32xf32>
    %16 = arith.addf %14, %15 : vector<8x32xf32>
    %17 = vector.shape_cast %16 : vector<8x32xf32> to vector<8x4x8xf32>
    %18 = tpu.transpose %17, [1, 0, 2] : vector<8x4x8xf32> -> vector<4x8x8xf32>
    %c0_6 = arith.constant 0 : index
    %c0_7 = arith.constant 0 : index
    %c0_8 = arith.constant 0 : index
    %19 = vector.load %arg10[%c0_6, %c0_7, %c0_8] : memref<4x8x8xf32, #tpu.memory_space<vmem>>, vector<4x8x8xf32>
    "tpu.trace_start"() <{level = 10 : i32, message = "hqd,hkd->hqk"}> : () -> ()
    %cst_9 = arith.constant dense<0.000000e+00> : vector<4x8x8xf32>
    %20 = tpu.matmul %18, %19, %cst_9 {dimension_numbers = #tpu.dot_dimension_numbers<[2], [2], [1], [1], [0, 0, 0, 1, 1, 1], [0], [0]>} : vector<4x8x8xf32>, vector<4x8x8xf32>, vector<4x8x8xf32> -> vector<4x8x8xf32>
    "tpu.trace_stop"() : () -> ()
    %cst_10 = arith.constant dense<0xFF800000> : vector<4x8xf32>
    %21 = vector.multi_reduction <maximumf>, %20, %cst_10 [2] : vector<4x8x8xf32> to vector<4x8xf32>
    %22 = vector.shape_cast %21 : vector<4x8xf32> to vector<4x8x1xf32>
    %23 = vector.broadcast %22 : vector<4x8x1xf32> to vector<4x8x8xf32>
    %24 = arith.subf %20, %23 : vector<4x8x8xf32>
    %25 = math.exp %24 : vector<4x8x8xf32>
    %cst_11 = arith.constant dense<0.000000e+00> : vector<4x8xf32>
    %26 = vector.multi_reduction <add>, %25, %cst_11 [2] : vector<4x8x8xf32> to vector<4x8xf32>
    %27 = vector.shape_cast %26 : vector<4x8xf32> to vector<4x8x1xf32>
    %28 = tpu.reciprocal %27 : vector<4x8x1xf32> -> vector<4x8x1xf32>
    %29 = vector.broadcast %28 : vector<4x8x1xf32> to vector<4x8x8xf32>
    %30 = arith.mulf %25, %29 : vector<4x8x8xf32>
    %c0_12 = arith.constant 0 : index
    %c0_13 = arith.constant 0 : index
    %c0_14 = arith.constant 0 : index
    %31 = vector.load %arg11[%c0_12, %c0_13, %c0_14] : memref<4x8x8xf32, #tpu.memory_space<vmem>>, vector<4x8x8xf32>
    "tpu.trace_start"() <{level = 10 : i32, message = "hqk,hkd->hqd"}> : () -> ()
    %cst_15 = arith.constant dense<0.000000e+00> : vector<4x8x8xf32>
    %32 = tpu.matmul %30, %31, %cst_15 {dimension_numbers = #tpu.dot_dimension_numbers<[2], [1], [1], [2], [0, 0, 0, 1, 1, 2], [0], [0]>} : vector<4x8x8xf32>, vector<4x8x8xf32>, vector<4x8x8xf32> -> vector<4x8x8xf32>
    "tpu.trace_stop"() : () -> ()
    %33 = tpu.transpose %32, [1, 0, 2] : vector<4x8x8xf32> -> vector<8x4x8xf32>
    %34 = vector.shape_cast %33 : vector<8x4x8xf32> to vector<8x32xf32>
    %c0_16 = arith.constant 0 : index
    %c0_17 = arith.constant 0 : index
    %35 = vector.load %arg7[%c0_16, %c0_17] : memref<32x32xf32, #tpu.memory_space<vmem>>, vector<32x32xf32>
    %cst_18 = arith.constant dense<0.000000e+00> : vector<8x32xf32>
    %36 = tpu.matmul %34, %35, %cst_18 {dimension_numbers = #tpu.dot_dimension_numbers<[1], [0], [0], [1], [0, 0, 1, 1], [], []>} : vector<8x32xf32>, vector<32x32xf32>, vector<8x32xf32> -> vector<8x32xf32>
    %37 = vector.broadcast %4 : vector<1x32xf32> to vector<8x32xf32>
    %38 = arith.addf %36, %37 : vector<8x32xf32>
    %c0_19 = arith.constant 0 : index
    %c0_20 = arith.constant 0 : index
    %c0_21 = arith.constant 0 : index
    %39 = vector.load %arg9[%c0_19, %c0_20, %c0_21] : memref<1x8x32xf32, #tpu.memory_space<vmem>>, vector<1x8x32xf32>
    %40 = vector.shape_cast %39 : vector<1x8x32xf32> to vector<8x32xf32>
    %41 = vector.shape_cast %38 : vector<8x32xf32> to vector<1x8x32xf32>
    tpu.vector_store %arg9[%c0_19, %c0_20, %c0_21], %41 {strides = array<i32>} : memref<1x8x32xf32, #tpu.memory_space<vmem>>, vector<1x8x32xf32>,
    return
  }
  func.func @transform_0(%arg0: i32, %arg1: i32) -> (i32, i32, i32) {
    %c0_i32 = arith.constant 0 : i32
    %c0_i32_0 = arith.constant 0 : i32
    %c0_i32_1 = arith.constant 0 : i32
    return %arg0, %c0_i32, %c0_i32_0 : i32, i32, i32
  }
  func.func @transform_1(%arg0: i32, %arg1: i32) -> (i32, i32, i32) {
    %c0_i32 = arith.constant 0 : i32
    %c0_i32_0 = arith.constant 0 : i32
    %c0_i32_1 = arith.constant 0 : i32
    return %arg0, %c0_i32, %c0_i32_0 : i32, i32, i32
  }
  func.func @transform_2(%arg0: i32, %arg1: i32) -> (i32, i32) {
    %c0_i32 = arith.constant 0 : i32
    %c0_i32_0 = arith.constant 0 : i32
    %c0_i32_1 = arith.constant 0 : i32
    return %c0_i32, %c0_i32_0 : i32, i32
  }
  func.func @transform_3(%arg0: i32, %arg1: i32) -> (i32, i32) {
    %c0_i32 = arith.constant 0 : i32
    %c0_i32_0 = arith.constant 0 : i32
    %c0_i32_1 = arith.constant 0 : i32
    return %c0_i32, %c0_i32_0 : i32, i32
  }
  func.func @transform_4(%arg0: i32, %arg1: i32) -> (i32, i32) {
    %c0_i32 = arith.constant 0 : i32
    %c0_i32_0 = arith.constant 0 : i32
    %c0_i32_1 = arith.constant 0 : i32
    return %c0_i32, %c0_i32_0 : i32, i32
  }
  func.func @transform_5(%arg0: i32, %arg1: i32) -> (i32, i32) {
    %c0_i32 = arith.constant 0 : i32
    %c0_i32_0 = arith.constant 0 : i32
    %c0_i32_1 = arith.constant 0 : i32
    return %c0_i32, %c0_i32_0 : i32, i32
  }
  func.func @transform_6(%arg0: i32, %arg1: i32) -> (i32, i32) {
    %c0_i32 = arith.constant 0 : i32
    %c0_i32_0 = arith.constant 0 : i32
    %c0_i32_1 = arith.constant 0 : i32
    return %c0_i32, %c0_i32_0 : i32, i32
  }
  func.func @transform_7(%arg0: i32, %arg1: i32) -> (i32, i32, i32) {
    %c0_i32 = arith.constant 0 : i32
    %c0_i32_0 = arith.constant 0 : i32
    return %arg0, %arg1, %c0_i32 : i32, i32, i32
  }
}

</mosaic_0001>

<bundles_post_ra>
// kernel: tpu_custom_call.1
= control target key start
LH: loop header
LB: loop body
LE: loop exit
PB: predicated region body
PF: predicated region fallthrough
CT: control target
= control target key end

     0   :  { %s3400_s0 = inlined_call_operand.hbm [shape: f32[2,8,32], index: 0, kind: input, shape index: {}]   ;;  %s3401_s1 = inlined_call_operand.hbm [shape: f32[2,1,8], index: 1, kind: input, shape index: {}]   ;;  %s3402_s2 = inlined_call_operand.hbm [shape: f32[32,32], index: 2, kind: input, shape index: {}]   ;;  %s3403_s3 = inlined_call_operand.hbm [shape: f32[32,32], index: 3, kind: input, shape index: {}]   ;;  %s3404_s4 = inlined_call_operand.hbm [shape: f32[32,32], index: 4, kind: input, shape index: {}]   ;;  %s3405_s5 = inlined_call_operand.hbm [shape: f32[32,32], index: 5, kind: input, shape index: {}]   ;;  %s3406_s6 = inlined_call_operand.hbm [shape: f32[6,32], index: 6, kind: input, shape index: {}]   ;;  %s3407_s7 = inlined_call_operand.hbm [shape: f32[2,8,32], index: 7, kind: output, shape index: {}]  }
   0x1   :  { %3413 = sst [smem:[#allocation23_spill]] %s3400_s0 }
   0x2   :  { %3414 = sst [smem:[#allocation24_spill]] %s3402_s2 }
   0x3   :  { %3415 = sst [smem:[#allocation25_spill]] %s3403_s3 }
   0x4   :  { %3416 = sst [smem:[#allocation26_spill]] %s3407_s7 }
   0x5   :  { %12 = vsyncpa [#allocation5], 0 }
   0x6   :  { %14 = vsyncpa [#allocation5 + $0x1], 0 }
   0x7   :  { %15 = vsyncpa [#allocation8], 0 }
   0x8   :  { %17 = vsyncpa [#allocation8 + $0x1], 0 }
   0x9   :  { %18 = vsyncpa [#allocation11], 0 }
   0xa   :  { %19 = vsyncpa [#allocation14], 0 }
   0xb   :  { %20 = vsyncpa [#allocation6], 0 }
   0xc   :  { %22 = vsyncpa [#allocation6 + $0x1], 0  ;;  %s2857_s24 = smov 0   ;;  %s2859_s25 = smov 0  }
   0xd   :  { %s2861_s26 = smov 0   ;;  %s2863_s27 = smov 0  }
   0xe   :  { %s2865_s28 = smov 0   ;;  %s2867_s29 = smov 0  }
   0xf LB: > { %s2888_s30 = sadd.s32 4294967295, %s2794_s29   ;;  %p2159_p0 = scmp.ge.s32.totalorder %s2794_s29, 1  ;;  %s2794_s29 = sphi %s2867_s29, %s28_s29   ;;  %s2790_s28 = sphi %s2865_s28, %s3446_s28   ;;  %s2786_s27 = sphi %s2863_s27, %s3445_s27   ;;  %s2782_s26 = sphi %s2861_s26, %s3444_s26   ;;  %s2778_s25 = sphi %s2859_s25, %s3443_s25   ;;  %s2774_s24 = sphi %s2857_s24, %s3442_s24  }
  0x10   : > { %p3409_p1 = scmp.eq.s32.totalorder %s2888_s30, 0  ;;  %p230_p2 = scmp.lt.s32.totalorder %s2794_s29, 3 }
  0x11   : > { %s2796_s9 = smov [#allocation9]   ;;  %s2797_s12 = smov [#allocation10]  }
  0x12   : > { %p2893_p3 = pnand %p2159_p0, %p230_p2  ;;  %s242_s10 = sshll.u32 %s2796_s9, 4  ;;  %s2897_s10 = int_to_ptr.vmem [resolvable:$true] %s242_s10 }
  0x13   : > { %s255_s13 = sshll.u32 %s2797_s12, 4  ;;  %s2798_s14 = smov [#allocation13]   ;;  %s2908_s13 = int_to_ptr.vmem [resolvable:$true] %s255_s13 }
  0x14   : > { %s3417_s8 = scalar_select %p2893_p3, 1, 0 }
  0x15   : > { %p2375_p4 = pneg %p2893_p3  ;;  %s2910_s15 = sshll.u32 %s2798_s14, 4  ;;  %s282_s15 = int_to_ptr.vmem [resolvable:$true] %s2910_s15 }
  0x16   : > { %s3419_s2 = sld [smem:[#allocation24_spill]] }
  0x17   : > { %p2904_p6 = pnand %p2375_p4, %p3409_p1 }
  0x19   : > { %p2920_p8 = pneg %p2904_p6 }
  0x1c   : > { %s2496_s18 = scalar_lea.hbm %s3419_s2, 512 }
  0x1d   : > { %p2497_p7 = scmp.ne.s32.totalorder %s3419_s2, %s2496_s18  ;;  %p2503_p11 = scmp.lt.u32.totalorder %s2496_s18, %s3419_s2 }
  0x1f   : > { %p2499_p9 = pnand %p2920_p8, %p2497_p7 }
  0x21   : > { %p2500_p10 = pneg %p2499_p9 }
  0x23   : > { %p2505_p12 = pnand %p2503_p11, %p2500_p10 }
  0x25   : > { %2508 = shalt.err (!%p2505_p12)
}
  0x26   : > { %s2509_s9 = scalar_lea.vmem %s2897_s10, 512  ;;  %p2517_p4 = scmp.lt.s32.totalorder %s2897_s10, %s2897_s10 }
  0x27   : > { %p2510_p13 = scmp.ne.s32.totalorder %s2897_s10, %s2509_s9  ;;  %p2518_p5 = scmp.lt.s32.totalorder %s2509_s9, %s2509_s9 }
  0x29   : > { %p2512_p0 = pnand %p2510_p13, %p2920_p8  ;;  %p2519_p7 = por %p2518_p5, %p2517_p4 }
  0x2b   : > { %p2513_p2 = pneg %p2512_p0 }
  0x2d   : > { %p2520_p9 = pnand %p2519_p7, %p2513_p2 }
  0x2f   : > { %2523 = shalt.err (!%p2520_p9)
}
  0x30   : > { %s2799_s12 = smov 128   ;;  %s2800_s14 = smov 8  }
  0x31   : > { %2378 = dma.hbm_to_vmem [thread:$0]  (!%p2904_p6), %s3419_s2, 512, %s2897_s10, [#allocation8], %s2799_s12, %s2799_s12, %s2800_s14  }
  0x32   : > { %s3421_s3 = sld [smem:[#allocation25_spill]] }
  0x38   : > { %s2524_s20 = scalar_lea.hbm %s3421_s3, 512 }
  0x39   : > { %p2525_p5 = scmp.ne.s32.totalorder %s3421_s3, %s2524_s20  ;;  %p2531_p12 = scmp.lt.u32.totalorder %s2524_s20, %s3421_s3 }
  0x3b   : > { %p2527_p10 = pnand %p2525_p5, %p2920_p8 }
  0x3d   : > { %p2528_p11 = pneg %p2527_p10 }
  0x3f   : > { %p2533_p13 = pnand %p2531_p12, %p2528_p11 }
  0x41   : > { %2536 = shalt.err (!%p2533_p13)
}
  0x42   : > { %s2537_s10 = scalar_lea.vmem %s2908_s13, 512  ;;  %p2545_p7 = scmp.lt.s32.totalorder %s2908_s13, %s2908_s13 }
  0x43   : > { %p2538_p0 = scmp.ne.s32.totalorder %s2908_s13, %s2537_s10  ;;  %p2546_p9 = scmp.lt.s32.totalorder %s2537_s10, %s2537_s10 }
  0x45   : > { %p2540_p2 = pnand %p2538_p0, %p2920_p8  ;;  %p2547_p5 = por %p2546_p9, %p2545_p7 }
  0x47   : > { %p2541_p4 = pneg %p2540_p2 }
  0x49   : > { %p2548_p10 = pnand %p2547_p5, %p2541_p4 }
  0x4b   : > { %2551 = shalt.err (!%p2548_p10)
}
  0x4c   : > { %2381 = dma.hbm_to_vmem [thread:$0]  (!%p2904_p6), %s3421_s3, 512, %s2908_s13, [#allocation11], %s2799_s12, %s2799_s12, %s2800_s14  }
  0x4d   : > { %s2552_s19 = scalar_lea.hbm %s3405_s5, 512 }
  0x4e   : > { %p2553_p11 = scmp.ne.s32.totalorder %s3405_s5, %s2552_s19  ;;  %p2559_p0 = scmp.lt.u32.totalorder %s2552_s19, %s3405_s5 }
  0x50   : > { %p2555_p12 = pnand %p2553_p11, %p2920_p8 }
  0x52   : > { %p2556_p13 = pneg %p2555_p12 }
  0x54   : > { %p2561_p2 = pnand %p2559_p0, %p2556_p13 }
  0x56   : > { %2564 = shalt.err (!%p2561_p2)
}
  0x57   : > { %s2565_s10 = scalar_lea.vmem %s282_s15, 512  ;;  %p2573_p5 = scmp.lt.s32.totalorder %s282_s15, %s282_s15 }
  0x58   : > { %p2566_p4 = scmp.ne.s32.totalorder %s282_s15, %s2565_s10  ;;  %p2574_p10 = scmp.lt.s32.totalorder %s2565_s10, %s2565_s10 }
  0x5a   : > { %p2568_p7 = pnand %p2566_p4, %p2920_p8  ;;  %p2575_p1 = por %p2574_p10, %p2573_p5 }
  0x5c   : > { %p2569_p9 = pneg %p2568_p7 }
  0x5e   : > { %p2576_p3 = pnand %p2575_p1, %p2569_p9 }
  0x60   : > { %2579 = shalt.err (!%p2576_p3)
}
  0x61   : > { %2387 = dma.hbm_to_vmem [thread:$0]  (!%p2904_p6), %s3405_s5, 512, %s282_s15, [#allocation14], %s2799_s12, %s2799_s12, %s2800_s14  }
  0x62   : > { %s2801_s16 = smov [#allocation12]   ;;  %s2802_s18 = smov [#allocation15]  }
  0x63   : > { %s268_s17 = sshll.u32 %s2801_s16, 4  ;;  %s295_s19 = sshll.u32 %s2802_s18, 4  ;;  %s269_s17 = int_to_ptr.vmem [resolvable:$true] %s268_s17  ;;  %s296_s19 = int_to_ptr.vmem [resolvable:$true] %s295_s19 }
  0x64   : > { %s2580_s23 = scalar_lea.hbm %s3404_s4, 512 }
  0x65   : > { %p2581_p1 = scmp.ne.s32.totalorder %s3404_s4, %s2580_s23  ;;  %p2587_p12 = scmp.lt.u32.totalorder %s2580_s23, %s3404_s4 }
  0x67   : > { %p2583_p3 = pnand %p2581_p1, %p2920_p8 }
  0x69   : > { %p2584_p11 = pneg %p2583_p3 }
  0x6b   : > { %p2589_p13 = pnand %p2587_p12, %p2584_p11 }
  0x6d   : > { %2592 = shalt.err (!%p2589_p13)
}
  0x6e   : > { %s2593_s15 = scalar_lea.vmem %s269_s17, 512  ;;  %p2601_p7 = scmp.lt.s32.totalorder %s269_s17, %s269_s17 }
  0x6f   : > { %p2594_p0 = scmp.ne.s32.totalorder %s269_s17, %s2593_s15  ;;  %p2602_p9 = scmp.lt.s32.totalorder %s2593_s15, %s2593_s15 }
  0x71   : > { %p2596_p2 = pnand %p2594_p0, %p2920_p8  ;;  %p2603_p5 = por %p2602_p9, %p2601_p7 }
  0x73   : > { %p2597_p4 = pneg %p2596_p2 }
  0x75   : > { %p2604_p10 = pnand %p2603_p5, %p2597_p4 }
  0x77   : > { %2607 = shalt.err (!%p2604_p10)
}
  0x78   : > { %2384 = dma.hbm_to_vmem [thread:$0]  (!%p2904_p6), %s3404_s4, 512, %s269_s17, [#allocation11], %s2799_s12, %s2799_s12, %s2800_s14  }
  0x79   : > { %s2608_s20 = scalar_lea.hbm %s3406_s6, 128 }
  0x7a   : > { %p2609_p1 = scmp.ne.s32.totalorder %s3406_s6, %s2608_s20  ;;  %p2615_p12 = scmp.lt.u32.totalorder %s2608_s20, %s3406_s6 }
  0x7c   : > { %p2611_p3 = pnand %p2609_p1, %p2920_p8 }
  0x7e   : > { %p2612_p11 = pneg %p2611_p3 }
  0x80   : > { %p2617_p13 = pnand %p2615_p12, %p2612_p11 }
  0x82   : > { %2620 = shalt.err (!%p2617_p13)
}
  0x83   : > { %s2621_s13 = scalar_lea.vmem %s296_s19, 128  ;;  %p2629_p7 = scmp.lt.s32.totalorder %s296_s19, %s296_s19 }
  0x84   : > { %p2622_p0 = scmp.ne.s32.totalorder %s296_s19, %s2621_s13  ;;  %p2630_p9 = scmp.lt.s32.totalorder %s2621_s13, %s2621_s13 }
  0x86   : > { %p2624_p2 = pnand %p2622_p0, %p2920_p8  ;;  %p2631_p5 = por %p2630_p9, %p2629_p7 }
  0x88   : > { %p2625_p4 = pneg %p2624_p2 }
  0x8a   : > { %p2632_p10 = pnand %p2631_p5, %p2625_p4 }
  0x8c   : > { %2635 = shalt.err (!%p2632_p10)
}
  0x8d   : > { %2390 = dma.hbm_to_vmem [thread:$0]  (!%p2904_p6), %s3406_s6, 128, %s296_s19, [#allocation14]  }
  0x8e   : > { %s2158_s21 = sadd.s32 4294967294, %s2794_s29   ;;  %s40_s17 = sadd.s32 1, %s2790_s28 }
  0x8f   : > { %s47_s11 = sadd.s32 1, %s2782_s26  ;;  %p42_p8 = scmp.ge.s32.totalorder %s40_s17, 2 }
  0x90   : > { %p54_p1 = scmp.ne.s32.totalorder %s2782_s26, %s2778_s25  ;;  %p55_p3 = scmp.eq.s32.totalorder %s2794_s29, 0 }
  0x91   : > { %p60_p11 = scmp.ne.s32.totalorder %s2778_s25, %s2774_s24  ;;  %s3448_s17 = smov (%p42_p8, %s40_s17), 0 }
  0x92   : > { %p3041_p12 = por %p55_p3, %p54_p1  ;;  %p3423_p13 = scmp.eq.s32.totalorder %s2888_s30, 0 }
  0x93   : > { %s44_s2 = ssub.s32 %s2790_s28, %s3448_s17  ;;  %p217_p0 = scmp.eq.s32.totalorder %s2888_s30, 1 }
  0x94   : > { %p3047_p6 = por %p3423_p13, %p60_p11  ;;  %p45_p2 = scmp.eq.s32.totalorder %s44_s2, 0 }
  0x95   : > { %p223_p4 = scmp.eq.s32.totalorder %s2158_s21, 1  ;;  %p3054_p7 = por %p217_p0, %p54_p1 }
  0x96   : > { %s3424_s19 = scalar_select %p3047_p6, 1, 0 }
  0x97   : > { %s3425_s7 = scalar_select %p3054_p7, 1, 0 }
  0x98   : > { %p2407_p9 = scmp.lt.s32.totalorder %s2794_s29, 2  ;;  %p3062_p5 = por %p223_p4, %p60_p11 }
  0x99   : > { %s3060_s16 = scalar_select %p45_p2, %s2782_s26, %s47_s11  }
  0x9a   : > { %s3426_s18 = scalar_select %p3062_p5, 1, 0 }
  0x9b   : > { %s3067_s20 = sand.u32 1, %s2782_s26   ;;  %s2167_s23 = sshll.u32 %s2790_s28, 7 }
  0x9c   : > { %s2166_s22 = sshll.u32 %s3067_s20, 3  ;;  %s3427_s0 = sld [smem:[#allocation23_spill]] }
  0x9d   : > { %s310_s12 = scalar_lea.vmem [#allocation4], %s2166_s22  ;;  %p3080_p10 = pnand %p2407_p9, %p3041_p12 }
  0x9e   : > { %s317_s14 = sshll.u32 %s310_s12, 4  ;;  %s307_s2 = scalar_lea.sflag [#allocation5], %s3067_s20  ;;  %s3076_s14 = int_to_ptr.vmem [resolvable:$true] %s317_s14 }
  0x9f   : > { %p2638_p1 = pneg %p3080_p10 }
  0xa2   : > { %s3074_s13 = scalar_lea.hbm %s3427_s0, %s2167_s23  ;;  %s2641_s15 = scalar_lea.hbm %s3427_s0, 256 }
  0xa3   : > { %s2636_s9 = scalar_lea.hbm %s3074_s13, 128  ;;  %p2642_p12 = scmp.lt.u32.totalorder %s3074_s13, %s3427_s0 }
  0xa4   : > { %p2637_p8 = scmp.ne.s32.totalorder %s3074_s13, %s2636_s9  ;;  %p2643_p13 = scmp.lt.u32.totalorder %s2641_s15, %s2636_s9 }
  0xa5   : > { %p2645_p2 = scmp.lt.u32.totalorder %s2636_s9, %s3074_s13 }
  0xa6   : > { %p2639_p3 = pnand %p2638_p1, %p2637_p8  ;;  %p2644_p0 = por %p2643_p13, %p2642_p12 }
  0xa8   : > { %p2640_p11 = pneg %p2639_p3  ;;  %p2646_p4 = por %p2645_p2, %p2644_p0 }
  0xaa   : > { %p2647_p9 = pnand %p2646_p4, %p2640_p11 }
  0xac   : > { %2650 = shalt.err (!%p2647_p9)
}
  0xad   : > { %s2651_s11 = scalar_lea.vmem %s3076_s14, 128  ;;  %s2803_s22 = smov [#allocation4]  }
  0xae   : > { %p2652_p8 = scmp.ne.s32.totalorder %s3076_s14, %s2651_s11  ;;  %s2656_s23 = sshll.u32 %s2803_s22, 4  ;;  %s2657_s23 = int_to_ptr.vmem [resolvable:$false] %s2656_s23 }
  0xaf   : > { %s2658_s10 = scalar_lea.vmem %s2657_s23, 256  ;;  %p2659_p7 = scmp.lt.s32.totalorder %s3076_s14, %s2657_s23 }
  0xb0   : > { %p2654_p3 = pnand %p2652_p8, %p2638_p1  ;;  %p2660_p12 = scmp.lt.s32.totalorder %s2658_s10, %s2651_s11 }
  0xb2   : > { %p2655_p5 = pneg %p2654_p3  ;;  %p2661_p13 = por %p2660_p12, %p2659_p7 }
  0xb4   : > { %p2662_p0 = pnand %p2661_p13, %p2655_p5 }
  0xb6   : > { %2665 = shalt.err (!%p2662_p0)
}
  0xb7   : > { %2394 = dma.hbm_to_vmem [thread:$0]  (!%p3080_p10), %s3074_s13, 128, %s3076_s14, %s307_s2  }
  0xb8   : > { %s2168_s9 = sshll.u32 %s2790_s28, 4  ;;  %s327_s15 = scalar_lea.vmem [#allocation7], %s3067_s20 }
  0xb9   : > { %s334_s12 = sshll.u32 %s327_s15, 4  ;;  %s3116_s23 = scalar_lea.hbm %s3401_s1, %s2168_s9  ;;  %s335_s12 = int_to_ptr.vmem [resolvable:$true] %s334_s12 }
  0xba   : > { %s3429_s11 = sand.u32 1, %s2794_s29   ;;  %s2666_s3 = scalar_lea.hbm %s3116_s23, 16 }
  0xbb   : > { %s325_s10 = scalar_lea.sflag [#allocation8], %s3429_s11  ;;  %p2667_p7 = scmp.ne.s32.totalorder %s3116_s23, %s2666_s3 }
  0xbc   : > { %s2671_s14 = scalar_lea.hbm %s3401_s1, 32  ;;  %p2672_p2 = scmp.lt.u32.totalorder %s3116_s23, %s3401_s1 }
  0xbd   : > { %p2669_p5 = pnand %p2667_p7, %p2638_p1  ;;  %p2673_p4 = scmp.lt.u32.totalorder %s2671_s14, %s2666_s3 }
  0xbe   : > { %p2675_p8 = scmp.lt.u32.totalorder %s2666_s3, %s3116_s23 }
  0xbf   : > { %p2670_p11 = pneg %p2669_p5  ;;  %p2674_p9 = por %p2673_p4, %p2672_p2 }
  0xc1   : > { %p2676_p3 = por %p2675_p8, %p2674_p9 }
  0xc3   : > { %p2677_p12 = pnand %p2676_p3, %p2670_p11 }
  0xc5   : > { %2680 = shalt.err (!%p2677_p12)
}
  0xc6   : > { %s2681_s9 = scalar_lea.vmem %s335_s12, 16  ;;  %s2804_s15 = smov [#allocation7]  }
  0xc7   : > { %p2682_p13 = scmp.ne.s32.totalorder %s335_s12, %s2681_s9  ;;  %s2686_s22 = sshll.u32 %s2804_s15, 4  ;;  %s2687_s22 = int_to_ptr.vmem [resolvable:$false] %s2686_s22 }
  0xc8   : > { %s2688_s11 = scalar_lea.vmem %s2687_s22, 32  ;;  %p2689_p5 = scmp.lt.s32.totalorder %s335_s12, %s2687_s22 }
  0xc9   : > { %p2684_p0 = pnand %p2682_p13, %p2638_p1  ;;  %p2690_p6 = scmp.lt.s32.totalorder %s2688_s11, %s2681_s9 }
  0xcb   : > { %p2685_p7 = pneg %p2684_p0  ;;  %p2691_p2 = por %p2690_p6, %p2689_p5 }
  0xcd   : > { %p2692_p4 = pnand %p2691_p2, %p2685_p7 }
  0xcf   : > { %2695 = shalt.err (!%p2692_p4)
}
  0xd0   : > { %2397 = dma.hbm_to_vmem [thread:$0]  (!%p3080_p10), %s3116_s23, 16, %s335_s12, %s325_s10  }
  0xd1   : > { %p3430_p11 = scmp.ne.s32.totalorder %s3417_s8, 0 }
  0xd2   : > { %s3142_s3 = sand.u32 (!%p3430_p11), 1, %s2778_s25   ;;  %p3431_p6 = scmp.ne.s32.totalorder (!%p3430_p11), %s3424_s19, 0 }
  0xd3   : > { %343 = sbr.rel (%p3430_p11) target bundleno = 1721 (0x6b9), region = 48  ;;  %s2170_s20 = sshll.u32 (!%p3430_p11), %s3142_s3, 3 }
  0xd4   : > { %s346_s13 = scalar_lea.sflag (!%p3430_p11), [#allocation5], %s3142_s3  ;;  %s3148_s14 = scalar_lea.vmem (!%p3430_p11), [#allocation4], %s2170_s20 }
  0xda   : > { %2749 = dma.done.wait (%p3431_p6), %s346_s13, 128  }
  0xdb   : > { %2751 = vsyncadd (%p3431_p6), %s346_s13, 4294967168  ;;  %s354_s8 = sand.u32 1, %s2888_s30  }
  0xdc   : > { %s355_s21 = scalar_lea.sflag [#allocation8], %s354_s8 }
  0xdd   : > { %2753 = dma.done.wait (%p3431_p6), %s355_s21, 16  }
  0xde   : > { %2755 = vsyncadd (%p3431_p6), %s355_s21, 4294967280  ;;  %p3432_p10 = scmp.eq.s32.totalorder %s2888_s30, 0 }
  0xe0   : > { %2757 = dma.done.wait (%p3432_p10), [#allocation8], 512   ;;  %p3433_p1 = pmov %p3432_p10 }
  0xe2   : > { %2759 = vsyncadd (%p3433_p1), [#allocation8], 4294966784  ;;  %p3434_p9 = pmov %p3433_p1 }
  0xe3   : > { %p3435_p8 = pmov %p3433_p1 }
  0xe4   : > { %2761 = dma.done.wait (%p3434_p9), [#allocation11], 1024  }
  0xe5   : > { %2763 = vsyncadd (%p3435_p8), [#allocation11], 4294966272  ;;  %p3436_p3 = pmov %p3433_p1 }
  0xe6   : > { %p3437_p12 = pmov %p3433_p1 }
  0xe7   : > { %2765 = dma.done.wait (%p3436_p3), [#allocation14], 640  }
  0xe8   : > { %2767 = vsyncadd (%p3437_p12), [#allocation14], 4294966656  ;;  %v2805_v0 = vmov 0.0|0.0   ;;  %vm2806_vm0 = vmmov 0   ;;  %v2807_v1 = vmov 0.0   ;;  %v418_v2 = vld [vmem:[#allocation10] sm:$0xff]  ;;  %v422_v15 = vlaneseq }
  0xe9   : > { %2325 = vmatprep.subr.bf16.mxu0 %v2805_v0  ;;  %2249 = vmatprep.mubr.msk.f32.mxu0 %vm2806_vm0, %v2807_v1  ;;  %v419_v3 = vld [vmem:[#allocation10 + $0x8] sm:$0xff]  ;;  %v420_v4 = vld [vmem:[#allocation10 + $0x10] sm:$0xff]  ;;  %v421_v6 = vld [vmem:[#allocation10 + $0x18] sm:$0xff]  ;;  %vm426_vm1 = vcmask 261120   ;;  %s2808_s30 = smov 104   ;;  %s2809_s19 = smov 120  }
  0xea   : > { %2331 = vmatprep.subr.bf16.mxu1 %v2805_v0  ;;  %2260 = vmatprep.mubr.msk.f32.mxu1 %vm2806_vm0, %v2807_v1  ;;  %v2326_v5 = vpack.c.bf16 %v419_v3, %v418_v2  ;;  %v2329_v7 = vpack.c.bf16 %v421_v6, %v420_v4  ;;  %v882_v8 = vld [vmem:[#allocation9] sm:$0xff]  ;;  %v883_v9 = vld [vmem:[#allocation9 + $0x8] sm:$0xff]  ;;  %v884_v12 = vld [vmem:[#allocation9 + $0x10] sm:$0xff]  ;;  %v3188_v16 = vshrl.u32 %v422_v15, 7  ;;  %s2810_s12 = smov 112   ;;  %vm724_vm2 = vcmask 64512  }
  0xeb   : > { %v417_v10 = vld [vmem:[%s3148_s14] sm:$0xff]  ;;  %v2338_v11 = vpack.c.bf16 %v883_v9, %v882_v8  ;;  %v3191_v18 = vld [vmem:[#allocation15] sm:$0x3f]  ;;  %v2811_v34 = vmov 1983009808   ;;  %s2813_s23 = smov 16  }
  0xec   : > { %2327 = vmatpush3.bf16.msra.mxu0 %v2326_v5  ;;  %v885_v13 = vld [vmem:[#allocation9 + $0x18] sm:$0xff]  ;;  %v424_v17 = vsub.s32 1, %v3188_v16  ;;  %v888_v23 = vsub.s32 0, %v3188_v16  ;;  %v500_v25 = vld [vmem:[#allocation12] sm:$0xff]  ;;  %v501_v26 = vld [vmem:[#allocation12 + $0x8] sm:$0xff]  ;;  %v591_v35 = vunpack.c.l.s4 %v2811_v34  ;;  %s2814_s10 = smov 8  }
  0xed   : > { %2328 = vmatprep.subr.bf16.mxu0 %v2805_v0  ;;  %v2341_v14 = vpack.c.bf16 %v885_v13, %v884_v12  ;;  %v2332_v27 = vpack.c.bf16 %v501_v26, %v500_v25  ;;  %v502_v31 = vld [vmem:[#allocation12 + $0x10] sm:$0xff]  ;;  %v503_v32 = vld [vmem:[#allocation12 + $0x18] sm:$0xff]  ;;  %v2812_v36 = vmov 1934713408   ;;  %s2815_s0 = smov 24   ;;  %vm1908_vm3 = vcmask 130048  }
  0xee   : > { %v425_v19 = vrot.slane %v3191_v18, %v424_v17  ;;  %v889_v24 = vrot.slane %v3191_v18, %v888_v23  ;;  %v2335_v33 = vpack.c.bf16 %v503_v32, %v502_v31  ;;  %v623_v37 = vunpack.c.l.s4 %v2812_v36  ;;  %s2202_s2 = sshll.u32 %s2786_s27, 7  ;;  %s411_s9 = scalar_lea.vmem [#allocation16], %s2170_s20 }
  0xef   : > { %2333 = vmatpush3.bf16.msra.mxu1 %v2332_v27  ;;  %v592_v38 = vunpack.c.0.s8 %v591_v35  ;;  %vm1910_vm4 = vcmask 195584   ;;  %s2009_s15 = sshll.u32 %s411_s9, 4  ;;  %s3438_s13 = sld [smem:[#allocation26_spill]]  ;;  %s3352_s15 = int_to_ptr.vmem [resolvable:$true] %s2009_s15 }
  0xf0   : > { %2330 = vmatpush3.bf16.msra.mxu0 %v2329_v7  ;;  %2334 = vmatprep.subr.bf16.mxu1 %v2805_v0  ;;  %v624_v41 = vunpack.c.0.s8 %v623_v37  ;;  %s1995_s8 = scalar_lea.sflag [#allocation6], %s3142_s3  ;;  %s2696_s27 = scalar_lea.vmem %s3352_s15, 128 }
  0xf1   : > { %2337 = vmatprep.subr.bf16.mxu0 %v2805_v0  ;;  %v3208_v42 = vsub.s32 %v592_v38, %v3188_v16  ;;  %p2697_p13 = scmp.ne.s32.totalorder %s3352_s15, %s2696_s27  ;;  %p3439_p0 = scmp.ne.s32.totalorder %s3425_s7, 0 }
  0xf2   : > { %v3211_v48 = vsub.s32 %v624_v41, %v3188_v16  ;;  %s2816_s20 = smov [#allocation16]  }
  0xf3   : > { %2250 = vmatmul.mubr.msk.f32.vlgmr.msra.gmra.mrb[0].mxu0 %vm426_vm1, %v417_v10  ;;  %2336 = vmatpush3.bf16.msra.mxu1 %v2335_v33  ;;  %p2698_p7 = pnand %p2697_p13, %p3439_p0  ;;  %s2700_s21 = sshll.u32 %s2816_s20, 4  ;;  %s2701_s21 = int_to_ptr.vmem [resolvable:$false] %s2700_s21 }
  0xf4   : > { %2339 = vmatpush3.bf16.msra.mxu0 %v2338_v11  ;;  %2271 = vmatprep.mubr.msk.f32.mxu0 %vm2806_vm0, %v2807_v1  ;;  %p2703_p2 = scmp.lt.s32.totalorder %s3352_s15, %s2701_s21 }
  0xf5   : > { %2340 = vmatprep.subr.bf16.mxu0 %v2805_v0  ;;  %2274 = vmatprep.subr.mxu1 %v2807_v1  ;;  %s3350_s14 = scalar_lea.hbm %s3438_s13, %s2202_s2  ;;  %p2699_p5 = pneg %p2698_p7 }
  0xf6   : > { %2261 = vmatmul.mubr.msk.f32.vlgmr.msra.gmra.mrb[0].mxu1 %vm426_vm1, %v417_v10 }
  0xf7   : > { %2276 = vmatprep.mubr.msk.f32.mxu1 %vm2806_vm0, %v2807_v1 }
  0xf8   : > { %2342 = vmatpush3.bf16.msra.mxu0 %v2341_v14 }
  0xf9   : > { %2294 = vmatprep.subr.mxu0 %v2807_v1 }
  0xfb   : > { %2272 = vmatmul.mubr.msk.f32.vlgmr.msra.gmra.mrb[2].mxu0 %vm426_vm1, %v417_v10 }
  0xfc   : > { %2296 = vmatprep.mubr.msk.f32.mxu0 %vm2806_vm0, %v2807_v1 }
 0x1c6   : > { %v496_v20 = vpop.f32.mrb[0].mxu0 }
 0x1c7   : > { %v497_v21 = vadd.f32 %v496_v20, %v425_v19  ;;  %v2251_v22 = vpop.f32.mrb[1].mxu0 }
 0x1c9   : > { %585 = vrot.lane.b32.xlu1 %v497_v21, %s2808_s30  ;;  %579 = vrot.lane.b32.xlu0 %v497_v21, %s2809_s19 }
 0x1cd   : > { %582 = vrot.lane.b32.xlu0 %v497_v21, %s2810_s12 }
 0x1ce   : > { %v960_v28 = vpop.f32.mrb[2].mxu0 }
 0x1cf   : > { %v961_v29 = vadd.f32 %v960_v28, %v889_v24  ;;  %v2273_v30 = vpop.f32.mrb[3].mxu0 }
 0x1d1   : > { %965 = vrot.lane.b32.xlu1 %v961_v29, %s2809_s19  ;;  %968 = vrot.lane.b32.xlu0 %v961_v29, %s2810_s12 }
 0x1d5   : > { %971 = vrot.lane.b32.xlu1 %v961_v29, %s2808_s30 }
 0x23b   : > { %v586_v39 = vpop.permute.xlu1 %585  ;;  %v580_v40 = vpop.permute.xlu0 %579 }
 0x23c   : > { %v604_v43 = vcombine.low %v580_v40, %v586_v39  ;;  %v605_v44 = vcombine.high %v580_v40, %v586_v39 }
 0x23e   : > { %v612_v49 = vrot.slane %v604_v43, %v3208_v42  ;;  %v619_v50 = vrot.slane %v605_v44, %v3208_v42 }
 0x23f   : > { %v583_v45 = vpop.permute.xlu0 %582 }
 0x240   : > { %v588_v46 = vcombine.low %v497_v21, %v583_v45  ;;  %v589_v47 = vcombine.high %v497_v21, %v583_v45 }
 0x242   : > { %v596_v51 = vrot.slane %v588_v46, %v3208_v42  ;;  %v603_v52 = vrot.slane %v589_v47, %v3208_v42 }
 0x243   : > { %v966_v53 = vpop.permute.xlu1 %965  ;;  %v969_v58 = vpop.permute.xlu0 %968 }
 0x244   : > { %v620_v54 = vcombine.low %v596_v51, %v612_v49  ;;  %v621_v55 = vcombine.high %v596_v51, %v612_v49  ;;  %v636_v56 = vcombine.low %v603_v52, %v619_v50  ;;  %v637_v57 = vcombine.high %v603_v52, %v619_v50 }
 0x245   : > { %v974_v63 = vcombine.low %v961_v29, %v969_v58  ;;  %v975_v2 = vcombine.high %v961_v29, %v969_v58 }
 0x246   : > { %v628_v59 = vrot.slane %v620_v54, %v3211_v48  ;;  %v635_v60 = vrot.slane %v621_v55, %v3211_v48  ;;  %v644_v61 = vrot.slane %v636_v56, %v3211_v48  ;;  %v651_v62 = vrot.slane %v637_v57, %v3211_v48 }
 0x247   : > { %v972_v3 = vpop.permute.xlu1 %971  ;;  %v982_v14 = vrot.slane %v974_v63, %v3208_v42  ;;  %v989_v15 = vrot.slane %v975_v2, %v3208_v42 }
 0x248   : > { %v656_v4 = vcombine.low %v628_v59, %v635_v60  ;;  %v2179_v5 = vcombine.high %v628_v59, %v635_v60  ;;  %v672_v6 = vcombine.low %v644_v61, %v651_v62  ;;  %v2180_v7 = vcombine.high %v644_v61, %v651_v62 }
 0x249   : > { %v990_v8 = vcombine.low %v966_v53, %v972_v3  ;;  %v991_v9 = vcombine.high %v966_v53, %v972_v3 }
 0x24a   : > { %v663_v10 = vrot.slane %v656_v4, %v3208_v42  ;;  %v671_v11 = vrot.slane %v2179_v5, %v3208_v42  ;;  %v679_v12 = vrot.slane %v672_v6, %v3208_v42  ;;  %v687_v13 = vrot.slane %v2180_v7, %v3208_v42  ;;  %v574_v4 = vpop.f32.mrb[0].mxu1 }
 0x24b   : > { %v998_v17 = vrot.slane %v990_v8, %v3208_v42  ;;  %v1005_v19 = vrot.slane %v991_v9, %v3208_v42  ;;  %v2262_v5 = vpop.f32.mrb[1].mxu1 }
 0x24c   : > { %v688_v20 = vcombine.low %v663_v10, %v671_v11  ;;  %v689_v21 = vcombine.high %v663_v10, %v671_v11  ;;  %v704_v22 = vcombine.low %v679_v12, %v687_v13  ;;  %v705_v23 = vcombine.high %v679_v12, %v687_v13 }
 0x24d   : > { %v1006_v24 = vcombine.low %v982_v14, %v998_v17  ;;  %v1007_v25 = vcombine.high %v982_v14, %v998_v17  ;;  %v1022_v26 = vcombine.low %v989_v15, %v1005_v19  ;;  %v1023_v27 = vcombine.high %v989_v15, %v1005_v19 }
 0x24e   : > { %v696_v28 = vrot.slane %v688_v20, %v3211_v48  ;;  %v703_v29 = vrot.slane %v689_v21, %v3211_v48  ;;  %v712_v30 = vrot.slane %v704_v22, %v3211_v48  ;;  %v719_v31 = vrot.slane %v705_v23, %v3211_v48 }
 0x24f   : > { %v1014_v32 = vrot.slane %v1006_v24, %v3211_v48  ;;  %v1021_v33 = vrot.slane %v1007_v25, %v3211_v48  ;;  %v1030_v34 = vrot.slane %v1022_v26, %v3211_v48  ;;  %v1037_v35 = vrot.slane %v1023_v27, %v3211_v48 }
 0x250   : > { %v720_v36 = vcombine.low %v696_v28, %v712_v30  ;;  %v721_v37 = vcombine.high %v696_v28, %v712_v30  ;;  %v722_v38 = vcombine.low %v703_v29, %v719_v31  ;;  %v723_v39 = vcombine.high %v703_v29, %v719_v31 }
 0x251   : > { %v1042_v40 = vcombine.low %v1014_v32, %v1021_v33  ;;  %v2184_v41 = vcombine.high %v1014_v32, %v1021_v33  ;;  %v1058_v43 = vcombine.low %v1030_v34, %v1037_v35  ;;  %v2185_v44 = vcombine.high %v1030_v34, %v1037_v35 }
 0x252   : > { %725 = vst.msk [vmem:[#allocation2] sm:$0xff] %vm724_vm2, %v720_v36  ;;  %726 = vst.msk [vmem:[#allocation2 + $0x8] sm:$0xff] %vm724_vm2, %v721_v37  ;;  %v506_v17 = vsub.s32 2, %v3188_v16 }
 0x253   : > { %727 = vst.msk [vmem:[#allocation2 + $0x10] sm:$0xff] %vm724_vm2, %v722_v38  ;;  %728 = vst.msk [vmem:[#allocation2 + $0x18] sm:$0xff] %vm724_vm2, %v723_v39  ;;  %v1049_v45 = vrot.slane %v1042_v40, %v3208_v42  ;;  %v1057_v46 = vrot.slane %v2184_v41, %v3208_v42  ;;  %v1065_v47 = vrot.slane %v1058_v43, %v3208_v42 }
 0x254   : > { %v1073_v49 = vrot.slane %v2185_v44, %v3208_v42  ;;  %v507_v21 = vrot.slane %v3191_v18, %v506_v17 }
 0x255   : > { %v1074_v50 = vcombine.low %v1049_v45, %v1057_v46  ;;  %v1075_v55 = vcombine.high %v1049_v45, %v1057_v46 }
 0x256   : > { %v1090_v51 = vcombine.low %v1065_v47, %v1073_v49  ;;  %v1091_v56 = vcombine.high %v1065_v47, %v1073_v49  ;;  %v575_v22 = vadd.f32 %v574_v4, %v507_v21 }
 0x257   : > { %v1082_v52 = vrot.slane %v1074_v50, %v3211_v48  ;;  %v1089_v60 = vrot.slane %v1075_v55, %v3211_v48 }
 0x258   : > { %v1098_v53 = vrot.slane %v1090_v51, %v3211_v48  ;;  %v1105_v61 = vrot.slane %v1091_v56, %v3211_v48 }
 0x259   : > { %v1110_v54 = vld [vmem:[#allocation2] sm:$0xff]  ;;  %v1111_v58 = vld [vmem:[#allocation2 + $0x8] sm:$0xff] }
 0x25a   : > { %2275 = vmatpush3.xpose.msk.msra.mxu1 %vm724_vm2, %v1110_v54  ;;  %v1106_v57 = vcombine.low %v1082_v52, %v1098_v53  ;;  %v1107_v59 = vcombine.high %v1082_v52, %v1098_v53  ;;  %v1112_v62 = vld [vmem:[#allocation2 + $0x10] sm:$0xff]  ;;  %v1108_v63 = vcombine.low %v1089_v60, %v1105_v61  ;;  %v1113_v2 = vld [vmem:[#allocation2 + $0x18] sm:$0xff]  ;;  %v1109_v3 = vcombine.high %v1089_v60, %v1105_v61 }
 0x25b   : > { %2279 = vmatprep.subr.mxu1 %v2807_v1 }
 0x25d   : > { %2277 = vmatmul.mubr.msk.f32.vlgmr.msra.gmra.mrb[2].mxu1 %vm724_vm2, %v1106_v57 }
 0x25e   : > { %2280 = vmatpush3.xpose.msk.msra.mxu1 %vm724_vm2, %v1111_v58  ;;  %2281 = vmatprep.mubr.msk.f32.mxu1 %vm2806_vm0, %v2807_v1 }
 0x25f   : > { %2284 = vmatprep.subr.mxu1 %v2807_v1 }
 0x261   : > { %2282 = vmatmul.mubr.msk.f32.vlgmr.msra.gmra.mrb[4].mxu1 %vm724_vm2, %v1107_v59 }
 0x262   : > { %2285 = vmatpush3.xpose.msk.msra.mxu1 %vm724_vm2, %v1112_v62  ;;  %2286 = vmatprep.mubr.msk.f32.mxu1 %vm2806_vm0, %v2807_v1 }
 0x263   : > { %2289 = vmatprep.subr.mxu1 %v2807_v1 }
 0x265   : > { %2287 = vmatmul.mubr.msk.f32.vlgmr.msra.gmra.mrb[6].mxu1 %vm724_vm2, %v1108_v63 }
 0x266   : > { %2290 = vmatpush3.xpose.msk.msra.mxu1 %vm724_vm2, %v1113_v2  ;;  %2291 = vmatprep.mubr.msk.f32.mxu1 %vm2806_vm0, %v2807_v1 }
 0x267   : > { %2299 = vmatprep.subr.mxu1 %v2807_v1 }
 0x269   : > { %2292 = vmatmul.mubr.msk.f32.vlgmr.msra.gmra.mrb[8].mxu1 %vm724_vm2, %v1109_v3 }
 0x26a   : > { %2301 = vmatprep.mubr.msk.f32.mxu1 %vm2806_vm0, %v2807_v1 }
 0x330   : > { %v1187_v6 = vpop.f32.mrb[2].mxu1 }
 0x331   : > { %v2278_v7 = vpop.f32.mrb[3].mxu1  ;;  %v1419_v8 = vsel %vm724_vm2, %v1187_v6, -inf }
 0x332   : > { %1420 = vmax.xlane.f32.xlu0 %v1419_v8 }
 0x334   : > { %v1263_v9 = vpop.f32.mrb[4].mxu1 }
 0x335   : > { %v2283_v10 = vpop.f32.mrb[5].mxu1  ;;  %v1422_v11 = vsel %vm724_vm2, %v1263_v9, -inf }
 0x336   : > { %1423 = vmax.xlane.f32.xlu1 %v1422_v11 }
 0x338   : > { %v1339_v12 = vpop.f32.mrb[6].mxu1 }
 0x339   : > { %v2288_v13 = vpop.f32.mrb[7].mxu1  ;;  %v1425_v14 = vsel %vm724_vm2, %v1339_v12, -inf }
 0x33a   : > { %1426 = vmax.xlane.f32.xlu0 %v1425_v14 }
 0x33c   : > { %v1415_v15 = vpop.f32.mrb[8].mxu1 }
 0x33d   : > { %v2293_v19 = vpop.f32.mrb[9].mxu1  ;;  %v1428_v20 = vsel %vm724_vm2, %v1415_v15, -inf }
 0x33e   : > { %1429 = vmax.xlane.f32.xlu0 %v1428_v20 }
 0x347   : > { %730 = vrot.lane.b32.xlu1 %v575_v22, %s2809_s19 }
 0x34b   : > { %736 = vrot.lane.b32.xlu1 %v575_v22, %s2808_s30  ;;  %s2702_s30 = scalar_lea.vmem %s2701_s21, 256 }
 0x34c   : > { %p2704_p4 = scmp.lt.s32.totalorder %s2702_s30, %s2696_s27 }
 0x34e   : > { %p2705_p11 = por %p2704_p4, %p2703_p2 }
 0x350   : > { %p2706_p6 = pnand %p2705_p11, %p2699_p5 }
 0x354   : > { %733 = vrot.lane.b32.xlu0 %v575_v22, %s2810_s12 }
 0x3bf   : > { %v1421_v23 = vpop.xlane.xlu0 %1420 }
 0x3c0   : > { %v1431_v24 = vsub.f32 %v1187_v6, %v1421_v23 }
 0x3c2   : > { %v1435_v25 = vmul.f32 1.442695, %v1431_v24 }
 0x3c3   : > { %v1424_v26 = vpop.xlane.xlu1 %1423 }
 0x3c4   : > { %2480 = vpow2.f32 %v1435_v25  ;;  %v1432_v27 = vsub.f32 %v1263_v9, %v1424_v26 }
 0x3c6   : > { %v1437_v28 = vmul.f32 1.442695, %v1432_v27 }
 0x3c7   : > { %v731_v29 = vpop.permute.xlu1 %730  ;;  %v1427_v30 = vpop.xlane.xlu0 %1426 }
 0x3c8   : > { %2482 = vpow2.f32 %v1437_v28  ;;  %v1433_v31 = vsub.f32 %v1339_v12, %v1427_v30 }
 0x3ca   : > { %v1439_v32 = vmul.f32 1.442695, %v1433_v31 }
 0x3cb   : > { %v737_v33 = vpop.permute.xlu1 %736  ;;  %v1430_v34 = vpop.xlane.xlu0 %1429 }
 0x3cc   : > { %2484 = vpow2.f32 %v1439_v32  ;;  %v1434_v35 = vsub.f32 %v1415_v15, %v1430_v34  ;;  %v755_v37 = vcombine.low %v731_v29, %v737_v33  ;;  %v756_v38 = vcombine.high %v731_v29, %v737_v33 }
 0x3ce   : > { %v3278_v36 = vpop.eup %2480  ;;  %v1441_v39 = vmul.f32 1.442695, %v1434_v35  ;;  %v763_v46 = vrot.slane %v755_v37, %v3208_v42  ;;  %v770_v47 = vrot.slane %v756_v38, %v3208_v42 }
 0x3cf   : > { %v734_v40 = vpop.permute.xlu0 %733  ;;  %v1443_v41 = vsel %vm724_vm2, %v3278_v36, 0.0 }
 0x3d0   : > { %2486 = vpow2.f32 %v1441_v39  ;;  %v739_v43 = vcombine.low %v575_v22, %v734_v40  ;;  %v740_v44 = vcombine.high %v575_v22, %v734_v40  ;;  %1444 = vadd.xlane.f32.xlu1 %v1443_v41  ;;  %v1912_v40 = vld [vmem:[#allocation13] sm:$0xff]  ;;  %v1913_v41 = vld [vmem:[#allocation13 + $0x8] sm:$0xff] }
 0x3d2   : > { %v3282_v45 = vpop.eup %2482  ;;  %v747_v49 = vrot.slane %v739_v43, %v3208_v42  ;;  %v754_v50 = vrot.slane %v740_v44, %v3208_v42  ;;  %v2344_v43 = vpack.c.bf16 %v1913_v41, %v1912_v40 }
 0x3d3   : > { %v1446_v51 = vsel %vm724_vm2, %v3282_v45, 0.0 }
 0x3d4   : > { %v771_v52 = vcombine.low %v747_v49, %v763_v46  ;;  %v772_v53 = vcombine.high %v747_v49, %v763_v46  ;;  %v787_v54 = vcombine.low %v754_v50, %v770_v47  ;;  %v788_v55 = vcombine.high %v754_v50, %v770_v47  ;;  %1447 = vadd.xlane.f32.xlu0 %v1446_v51 }
 0x3d6   : > { %v2485_v56 = vpop.eup %2484  ;;  %v779_v57 = vrot.slane %v771_v52, %v3211_v48  ;;  %v786_v58 = vrot.slane %v772_v53, %v3211_v48  ;;  %v795_v59 = vrot.slane %v787_v54, %v3211_v48  ;;  %v802_v60 = vrot.slane %v788_v55, %v3211_v48 }
 0x3d7   : > { %v1449_v61 = vsel %vm724_vm2, %v2485_v56, 0.0 }
 0x3d8   : > { %v807_v62 = vcombine.low %v779_v57, %v786_v58  ;;  %v2181_v63 = vcombine.high %v779_v57, %v786_v58  ;;  %v823_v2 = vcombine.low %v795_v59, %v802_v60  ;;  %v2182_v3 = vcombine.high %v795_v59, %v802_v60  ;;  %1450 = vadd.xlane.f32.xlu0 %v1449_v61 }
 0x3da   : > { %v2487_v4 = vpop.eup %2486  ;;  %v814_v5 = vrot.slane %v807_v62, %v3208_v42  ;;  %v822_v6 = vrot.slane %v2181_v63, %v3208_v42  ;;  %v830_v7 = vrot.slane %v823_v2, %v3208_v42  ;;  %v838_v8 = vrot.slane %v2182_v3, %v3208_v42  ;;  %v1914_v63 = vld [vmem:[#allocation13 + $0x10] sm:$0xff]  ;;  %v1915_v2 = vld [vmem:[#allocation13 + $0x18] sm:$0xff] }
 0x3db   : > { %v1452_v9 = vsel %vm724_vm2, %v2487_v4, 0.0 }
 0x3dc   : > { %v839_v10 = vcombine.low %v814_v5, %v822_v6  ;;  %v840_v11 = vcombine.high %v814_v5, %v822_v6  ;;  %v855_v12 = vcombine.low %v830_v7, %v838_v8  ;;  %v856_v13 = vcombine.high %v830_v7, %v838_v8  ;;  %1453 = vadd.xlane.f32.xlu1 %v1452_v9 }
 0x3dd   : > { %v2347_v7 = vpack.c.bf16 %v1915_v2, %v1914_v63 }
 0x3de   : > { %v847_v14 = vrot.slane %v839_v10, %v3211_v48  ;;  %v854_v15 = vrot.slane %v840_v11, %v3211_v48  ;;  %v863_v17 = vrot.slane %v855_v12, %v3211_v48  ;;  %v870_v19 = vrot.slane %v856_v13, %v3211_v48 }
 0x3e0   : > { %v871_v20 = vcombine.low %v847_v14, %v863_v17  ;;  %v872_v21 = vcombine.high %v847_v14, %v863_v17  ;;  %v873_v22 = vcombine.low %v854_v15, %v870_v19  ;;  %v874_v23 = vcombine.high %v854_v15, %v870_v19 }
 0x3e2   : > { %875 = vst.msk [vmem:[#allocation3] sm:$0xff] %vm724_vm2, %v871_v20  ;;  %876 = vst.msk [vmem:[#allocation3 + $0x8] sm:$0xff] %vm724_vm2, %v872_v21 }
 0x3e3   : > { %877 = vst.msk [vmem:[#allocation3 + $0x10] sm:$0xff] %vm724_vm2, %v873_v22  ;;  %878 = vst.msk [vmem:[#allocation3 + $0x18] sm:$0xff] %vm724_vm2, %v874_v23 }
 0x3e9   : > { %v1463_v24 = vld [vmem:[#allocation3] sm:$0xff]  ;;  %v1464_v25 = vld [vmem:[#allocation3 + $0x8] sm:$0xff] }
 0x3ea   : > { %2295 = vmatpush3.msra.mxu0 %v1463_v24  ;;  %2300 = vmatpush3.msra.mxu1 %v1464_v25  ;;  %v1465_v32 = vld [vmem:[#allocation3 + $0x10] sm:$0xff]  ;;  %v1466_v35 = vld [vmem:[#allocation3 + $0x18] sm:$0xff] }
 0x3eb   : > { %2304 = vmatprep.subr.mxu0 %v2807_v1  ;;  %2309 = vmatprep.subr.mxu1 %v2807_v1 }
 0x45d   : > { %v1445_v26 = vpop.xlane.xlu1 %1444 }
 0x45e   : > { %2488 = vrcp.f32 %v1445_v26 }
 0x461   : > { %v1448_v27 = vpop.xlane.xlu0 %1447 }
 0x462   : > { %2490 = vrcp.f32 %v1448_v27 }
 0x465   : > { %v1451_v28 = vpop.xlane.xlu0 %1450 }
 0x466   : > { %2492 = vrcp.f32 %v1451_v28 }
 0x468   : > { %v2489_v29 = vpop.eup %2488 }
 0x469   : > { %v1459_v30 = vmul.f32 %v2489_v29, %v3278_v36  ;;  %v1454_v31 = vpop.xlane.xlu1 %1453 }
 0x46a   : > { %2494 = vrcp.f32 %v1454_v31 }
 0x46b   : > { %2297 = vmatmul.mubr.msk.f32.vlgmr.msra.gmra.mrb[4].mxu0 %vm724_vm2, %v1459_v30 }
 0x46c   : > { %v2491_v33 = vpop.eup %2490  ;;  %2305 = vmatpush3.msra.mxu0 %v1465_v32  ;;  %2306 = vmatprep.mubr.msk.f32.mxu0 %vm2806_vm0, %v2807_v1 }
 0x46d   : > { %v1460_v34 = vmul.f32 %v2491_v33, %v3282_v45  ;;  %2343 = vmatprep.subr.bf16.mxu0 %v2805_v0 }
 0x46f   : > { %2302 = vmatmul.mubr.msk.f32.vlgmr.msra.gmra.mrb[10].mxu1 %vm724_vm2, %v1460_v34  ;;  %v1918_v34 = vsub.s32 3, %v3188_v16 }
 0x470   : > { %v2493_v37 = vpop.eup %2492  ;;  %2310 = vmatpush3.msra.mxu1 %v1466_v35  ;;  %2311 = vmatprep.mubr.msk.f32.mxu1 %vm2806_vm0, %v2807_v1 }
 0x471   : > { %v1461_v36 = vmul.f32 %v2493_v37, %v2485_v56  ;;  %v1919_v35 = vrot.slane %v3191_v18, %v1918_v34 }
 0x473   : > { %2307 = vmatmul.mubr.msk.f32.vlgmr.msra.gmra.mrb[6].mxu0 %vm724_vm2, %v1461_v36 }
 0x474   : > { %v2495_v38 = vpop.eup %2494  ;;  %2322 = vmatprep.mubr.msk.f32.mxu0 %vm2806_vm0, %v2807_v1  ;;  %2345 = vmatpush3.bf16.msra.mxu0 %v2344_v43 }
 0x475   : > { %v1462_v39 = vmul.f32 %v2495_v38, %v2487_v4  ;;  %2346 = vmatprep.subr.bf16.mxu0 %v2805_v0 }
 0x477   : > { %2312 = vmatmul.mubr.msk.f32.vlgmr.msra.gmra.mrb[12].mxu1 %vm724_vm2, %v1462_v39 }
 0x478   : > { %2348 = vmatpush3.bf16.msra.mxu0 %v2347_v7 }
 0x53e   : > { %v1536_v44 = vpop.f32.mrb[4].mxu0 }
 0x53f   : > { %v2298_v45 = vpop.f32.mrb[5].mxu0 }
 0x542   : > { %v1609_v46 = vpop.f32.mrb[10].mxu1 }
 0x543   : > { %v2303_v47 = vpop.f32.mrb[11].mxu1 }
 0x546   : > { %v1682_v49 = vpop.f32.mrb[6].mxu0 }
 0x547   : > { %v1759_v50 = vcombine.low %v1536_v44, %v1682_v49  ;;  %v1760_v51 = vcombine.high %v1536_v44, %v1682_v49  ;;  %v2308_v52 = vpop.f32.mrb[7].mxu0 }
 0x549   : > { %v1767_v56 = vrot.slane %v1759_v50, %v3208_v42  ;;  %v1774_v57 = vrot.slane %v1760_v51, %v3208_v42 }
 0x54a   : > { %v1755_v53 = vpop.f32.mrb[12].mxu1 }
 0x54b   : > { %v1775_v54 = vcombine.low %v1609_v46, %v1755_v53  ;;  %v1776_v1 = vcombine.high %v1609_v46, %v1755_v53  ;;  %v2313_v55 = vpop.f32.mrb[13].mxu1 }
 0x54d   : > { %v1783_v58 = vrot.slane %v1775_v54, %v3208_v42  ;;  %v1790_v0 = vrot.slane %v1776_v1, %v3208_v42 }
 0x54f   : > { %v1791_v59 = vcombine.low %v1767_v56, %v1783_v58  ;;  %v1792_v60 = vcombine.high %v1767_v56, %v1783_v58  ;;  %v1807_v61 = vcombine.low %v1774_v57, %v1790_v0  ;;  %v1808_v62 = vcombine.high %v1774_v57, %v1790_v0 }
 0x551   : > { %v1799_v3 = vrot.slane %v1791_v59, %v3211_v48  ;;  %v1806_v4 = vrot.slane %v1792_v60, %v3211_v48  ;;  %v1815_v5 = vrot.slane %v1807_v61, %v3211_v48  ;;  %v1822_v6 = vrot.slane %v1808_v62, %v3211_v48 }
 0x553   : > { %v1827_v8 = vcombine.low %v1799_v3, %v1806_v4  ;;  %v2198_v9 = vcombine.high %v1799_v3, %v1806_v4  ;;  %v1843_v10 = vcombine.low %v1815_v5, %v1822_v6  ;;  %v2199_v11 = vcombine.high %v1815_v5, %v1822_v6 }
 0x555   : > { %v1834_v12 = vrot.slane %v1827_v8, %v3208_v42  ;;  %v1842_v13 = vrot.slane %v2198_v9, %v3208_v42  ;;  %v1850_v14 = vrot.slane %v1843_v10, %v3208_v42  ;;  %v1858_v15 = vrot.slane %v2199_v11, %v3208_v42 }
 0x557   : > { %v1860_v17 = vcombine.high %v1834_v12, %v1842_v13  ;;  %v1876_v19 = vcombine.high %v1850_v14, %v1858_v15  ;;  %v1859_v20 = vcombine.low %v1834_v12, %v1842_v13  ;;  %v1875_v21 = vcombine.low %v1850_v14, %v1858_v15 }
 0x559   : > { %v1874_v22 = vrot.slane %v1860_v17, %v3211_v48  ;;  %v1890_v23 = vrot.slane %v1876_v19, %v3211_v48  ;;  %v1867_v24 = vrot.slane %v1859_v20, %v3211_v48  ;;  %v1883_v25 = vrot.slane %v1875_v21, %v3211_v48 }
 0x55b   : > { %v1893_v26 = vcombine.low %v1874_v22, %v1890_v23  ;;  %v1892_v27 = vcombine.high %v1867_v24, %v1883_v25  ;;  %v1894_v28 = vcombine.high %v1874_v22, %v1890_v23  ;;  %v1891_v29 = vcombine.low %v1867_v24, %v1883_v25 }
 0x55d   : > { %1900 = vrot.lane.b32.xlu1 %v1893_v26, %s2813_s23  ;;  %1896 = vrot.lane.b32.xlu0 %v1892_v27, %s2814_s10 }
 0x561   : > { %1904 = vrot.lane.b32.xlu1 %v1894_v28, %s2815_s0 }
 0x5cf   : > { %v1901_v42 = vpop.permute.xlu1 %1900  ;;  %v1897_v30 = vpop.permute.xlu0 %1896 }
 0x5d0   : > { %v1907_v31 = vsel %vm724_vm2, %v1891_v29, %v1897_v30 }
 0x5d1   : > { %v1909_v32 = vsel %vm1908_vm3, %v1907_v31, %v1901_v42 }
 0x5d3   : > { %v1905_v48 = vpop.permute.xlu1 %1904 }
 0x5d4   : > { %v1911_v33 = vsel %vm1910_vm4, %v1909_v32, %v1905_v48 }
 0x5d5   : > { %2323 = vmatmul.mubr.msk.f32.vlgmr.msra.gmra.mrb[8].mxu0 %vm426_vm1, %v1911_v33 }
 0x6a8   : > { %v1989_v37 = vpop.f32.mrb[8].mxu0 }
 0x6a9   : > { %v1990_v36 = vadd.f32 %v1989_v37, %v1919_v35  ;;  %v2324_v38 = vpop.f32.mrb[9].mxu0 }
 0x6ab   : > { %1993 = vst.msk [vmem:[%s411_s9] sm:$0xff] %vm426_vm1, %v1990_v36 }
 0x6ac   : > { %2709 = shalt.err (!%p2706_p6)
}
 0x6ad   : > { %s2710_s3 = scalar_lea.hbm %s3350_s14, 128  ;;  %s2714_s23 = scalar_lea.hbm %s3438_s13, 256 }
 0x6ae   : > { %p2711_p10 = scmp.ne.s32.totalorder %s3350_s14, %s2710_s3  ;;  %p2715_p8 = scmp.lt.u32.totalorder %s3350_s14, %s3438_s13 }
 0x6af   : > { %p2716_p3 = scmp.lt.u32.totalorder %s2714_s23, %s2710_s3  ;;  %p2718_p13 = scmp.lt.u32.totalorder %s2710_s3, %s3350_s14 }
 0x6b0   : > { %p2712_p1 = pnand %p2711_p10, %p3439_p0 }
 0x6b1   : > { %p2717_p12 = por %p2716_p3, %p2715_p8 }
 0x6b2   : > { %p2713_p9 = pneg %p2712_p1 }
 0x6b3   : > { %p2719_p7 = por %p2718_p13, %p2717_p12 }
 0x6b5   : > { %p2720_p5 = pnand %p2719_p7, %p2713_p9 }
 0x6b7   : > { %2723 = shalt.err (!%p2720_p5)
}
 0x6b8   : > { %2373 = dma.vmem_to_hbm [thread:$0]  (%p3439_p0), %s3352_s15, 128, %s3350_s14, %s1995_s8  }
 0x6b9 PF: > { %s2021_s2 = sand.u32 1, %s2774_s24   ;;  %p3440_p2 = scmp.ne.s32.totalorder %s3426_s18, 0 }
 0x6ba   : > { %p3441_p4 = scmp.ge.s32.totalorder %s2794_s29, 2  ;;  %s2022_s9 = scalar_lea.sflag [#allocation6], %s2021_s2 }
 0x6bc   : > { %p2399_p11 = pnand %p3441_p4, %p3440_p2 }
 0x6be   : > { %2769 = dma.done.wait (!%p2399_p11), %s2022_s9, 128  }
 0x6bf   : > { %2771 = vsyncadd (!%p2399_p11), %s2022_s9, 4294967168  ;;  %s28_s29 = sadd.s32 1, %s2794_s29   ;;  %s3442_s24 = smov %s2778_s25 }
 0x6c0   : > { %p25_p6 = scmp.ge.s32.totalorder %s28_s29, 4   ;;  %s3443_s25 = smov %s2782_s26 }
 0x6c1   : > { %s3444_s26 = smov %s3060_s16  ;;  %s3445_s27 = smov %s2790_s28 }
 0x6c2   : > { %s3446_s28 = smov %s3448_s17  ;;  %27 = sbr.rel (!%p25_p6) target bundleno = 15 (0xf), region = 131 }
 0x6c9   :  { %2027 = vsyncpa [#allocation5], 1 }
 0x6ca   :  { %2029 = vsyncpa [#allocation5 + $0x1], 1 }
 0x6cb   :  { %2030 = vsyncpa [#allocation8], 1 }
 0x6cc   :  { %2032 = vsyncpa [#allocation8 + $0x1], 1 }
 0x6cd   :  { %2033 = vsyncpa [#allocation11], 1 }
 0x6ce   :  { %2034 = vsyncpa [#allocation14], 1 }
 0x6cf   :  { %2035 = vsyncpa [#allocation6], 1 }
 0x6d0   :  { %2037 = vsyncpa [#allocation6 + $0x1], 1 }

</bundles_post_ra>
